<compile_context>
chip_gen: v6e
topology: v6e:2x2x1
jax: 0.10.0
libtpu: 0.0.40
codegen_flags: <defaults>
</compile_context>

<pallas_src>
import functools

import jax
import jax.numpy as jnp
from jax.experimental import pallas as pl
from jax.experimental.pallas import tpu as pltpu


def _round_up(x, m):
    return ((x + m - 1) // m) * m


def _generator_kernel(x_ref, w1_ref, b1_ref, w2_ref, b2_ref, w3_ref, b3_ref,
                      o_ref):
    # Layer 1: (tb, Dp) @ (Dp, Hp) + (1, Hp) -> sigmoid   (f32 accumulate)
    h1 = jax.nn.sigmoid(
        jnp.dot(x_ref[...], w1_ref[...], preferred_element_type=jnp.float32)
        + b1_ref[...])
    # Layer 2: (tb, Hp) @ (Hp, Hp) + (1, Hp) -> sigmoid
    h2 = jax.nn.sigmoid(
        jnp.dot(h1.astype(w2_ref.dtype), w2_ref[...],
                preferred_element_type=jnp.float32) + b2_ref[...])
    # Layer 3: (tb, Hp) @ (Hp, Dp) + (1, Dp) -> sigmoid
    out = jax.nn.sigmoid(
        jnp.dot(h2.astype(w3_ref.dtype), w3_ref[...],
                preferred_element_type=jnp.float32) + b3_ref[...])
    o_ref[...] = out.astype(o_ref.dtype)


@functools.partial(jax.jit, static_argnames=("batch_tile",))
def generator_forward(x, params, batch_tile=512):
    """3-layer sigmoid MLP (PyTorch Generator) as one fused Pallas kernel.

    x: (B, input_size) float32
    params: dict with w1 (D,H), b1 (1,H), w2 (H,H), b2 (1,H), w3 (H,D), b3 (1,D)
            (weights stored transposed relative to nn.Linear, i.e. (in, out))
    """
    w1, b1, w2, b2, w3, b3 = (params["w1"], params["b1"], params["w2"],
                              params["b2"], params["w3"], params["b3"])
    B, D = x.shape
    H = w1.shape[1]

    # Lane-pad feature dims to multiples of 128 (full vregs, unmasked stores).
    Dp = _round_up(D, 128)
    Hp = _round_up(H, 128)

    # Effective batch tile: multiple of 8 (f32 sublanes), no bigger than needed.
    tb = min(batch_tile, _round_up(B, 8))
    tb = _round_up(tb, 8)
    Bp = _round_up(B, tb)

    # Zero-pad inputs/weights; cast MXU operands to bf16 once, here.
    xp = jnp.zeros((Bp, Dp), jnp.bfloat16).at[:B, :D].set(
        x.astype(jnp.bfloat16))
    w1p = jnp.zeros((Dp, Hp), jnp.bfloat16).at[:D, :H].set(
        w1.astype(jnp.bfloat16))
    w2p = jnp.zeros((Hp, Hp), jnp.bfloat16).at[:H, :H].set(
        w2.astype(jnp.bfloat16))
    w3p = jnp.zeros((Hp, Dp), jnp.bfloat16).at[:H, :D].set(
        w3.astype(jnp.bfloat16))
    b1p = jnp.zeros((1, Hp), jnp.float32).at[:, :H].set(b1)
    b2p = jnp.zeros((1, Hp), jnp.float32).at[:, :H].set(b2)
    b3p = jnp.zeros((1, Dp), jnp.float32).at[:, :D].set(b3)

    grid = (Bp // tb,)

    in_specs = [
        pl.BlockSpec((tb, Dp), lambda i: (i, 0)),   # x (batch-tiled)
        pl.BlockSpec((Dp, Hp), lambda i: (0, 0)),   # w1 (resident)
        pl.BlockSpec((1, Hp), lambda i: (0, 0)),    # b1
        pl.BlockSpec((Hp, Hp), lambda i: (0, 0)),   # w2
        pl.BlockSpec((1, Hp), lambda i: (0, 0)),    # b2
        pl.BlockSpec((Hp, Dp), lambda i: (0, 0)),   # w3
        pl.BlockSpec((1, Dp), lambda i: (0, 0)),    # b3
    ]
    out_specs = pl.BlockSpec((tb, Dp), lambda i: (i, 0))  # lane-dense output

    out_padded = pl.pallas_call(
        _generator_kernel,
        out_shape=jax.ShapeDtypeStruct((Bp, Dp), jnp.float32),
        grid=grid,
        in_specs=in_specs,
        out_specs=out_specs,
        compiler_params=pltpu.CompilerParams(
            dimension_semantics=("parallel",)),
    )(xp, w1p, b1p, w2p, b2p, w3p, b3p)

    return out_padded[:B, :D]


def init_generator_params(key, input_size, layer_size=64, dtype=jnp.float32):
    """Deterministic init mimicking nn.Linear's U(-1/sqrt(fan_in), 1/sqrt(fan_in))."""
    ks = jax.random.split(key, 6)

    def _uniform(k, shape, fan_in):
        bound = 1.0 / jnp.sqrt(jnp.asarray(fan_in, dtype))
        return jax.random.uniform(k, shape, dtype, -bound, bound)

    return {
        # stored as (in, out) so the kernel does x @ W
        "w1": _uniform(ks[0], (input_size, layer_size), input_size),
        "b1": _uniform(ks[1], (1, layer_size), input_size),
        "w2": _uniform(ks[2], (layer_size, layer_size), layer_size),
        "b2": _uniform(ks[3], (1, layer_size), layer_size),
        "w3": _uniform(ks[4], (layer_size, input_size), layer_size),
        "b3": _uniform(ks[5], (1, input_size), layer_size),
    }


def generator_reference(x, params):
    """Pure-JAX f32 reference of the PyTorch forward pass."""
    h = jax.nn.sigmoid(x @ params["w1"] + params["b1"])
    h = jax.nn.sigmoid(h @ params["w2"] + params["b2"])
    return jax.nn.sigmoid(h @ params["w3"] + params["b3"])


if __name__ == "__main__":
    input_size = 32
    layer_size = 64
    batch = 256          # small but enough for a 2-step grid (both v7x cores)
    batch_tile = 128

    key = jax.random.PRNGKey(0)
    pkey, xkey = jax.random.split(key)
    params = init_generator_params(pkey, input_size, layer_size)
    x = jax.random.normal(xkey, (batch, input_size), jnp.float32)

    out = generator_forward(x, params, batch_tile=batch_tile)
    out = jax.block_until_ready(out)

    ref = generator_reference(x, params)
    assert out.shape == (batch, input_size), out.shape
    # bf16 MXU operands (f32 accumulation) -> relaxed tolerance vs f32 reference.
    assert jnp.allclose(out, ref, atol=2e-2, rtol=2e-2), "mismatch vs reference"

    print("KERNEL_OK")
</pallas_src>

<mosaic_0001>
module attributes {stable_mosaic.version = 11 : i64} {
  func.func @_generator_kernel(%arg0: i32, %arg1: memref<128x128xbf16, #tpu.memory_space<vmem>>, %arg2: memref<128x128xbf16, #tpu.memory_space<vmem>>, %arg3: memref<1x128xf32, #tpu.memory_space<vmem>>, %arg4: memref<128x128xbf16, #tpu.memory_space<vmem>>, %arg5: memref<1x128xf32, #tpu.memory_space<vmem>>, %arg6: memref<128x128xbf16, #tpu.memory_space<vmem>>, %arg7: memref<1x128xf32, #tpu.memory_space<vmem>>, %arg8: memref<128x128xf32, #tpu.memory_space<vmem>>) attributes {dimension_semantics = [#tpu.dimension_semantics<parallel>], iteration_bounds = array<i64: 2>, scalar_prefetch = 0 : i64, scratch_operands = 0 : i64, tpu.core_type = #tpu.core_type<tc>, window_params = [{transform_indices = @transform_0, window_bounds = array<i64: 128, 128>}, {pipeline_mode = #tpu.pipeline_mode<synchronous>, transform_indices = @transform_1, window_bounds = array<i64: 128, 128>}, {pipeline_mode = #tpu.pipeline_mode<synchronous>, transform_indices = @transform_2, window_bounds = array<i64: 1, 128>}, {pipeline_mode = #tpu.pipeline_mode<synchronous>, transform_indices = @transform_3, window_bounds = array<i64: 128, 128>}, {pipeline_mode = #tpu.pipeline_mode<synchronous>, transform_indices = @transform_4, window_bounds = array<i64: 1, 128>}, {pipeline_mode = #tpu.pipeline_mode<synchronous>, transform_indices = @transform_5, window_bounds = array<i64: 128, 128>}, {pipeline_mode = #tpu.pipeline_mode<synchronous>, transform_indices = @transform_6, window_bounds = array<i64: 1, 128>}, {transform_indices = @transform_7, window_bounds = array<i64: 128, 128>}]} {
    %c0 = arith.constant 0 : index
    %c0_0 = arith.constant 0 : index
    %0 = vector.load %arg1[%c0, %c0_0] : memref<128x128xbf16, #tpu.memory_space<vmem>>, vector<128x128xbf16>
    %c0_1 = arith.constant 0 : index
    %c0_2 = arith.constant 0 : index
    %1 = vector.load %arg2[%c0_1, %c0_2] : memref<128x128xbf16, #tpu.memory_space<vmem>>, vector<128x128xbf16>
    %cst = arith.constant dense<0.000000e+00> : vector<128x128xf32>
    %2 = tpu.matmul %0, %1, %cst {dimension_numbers = #tpu.dot_dimension_numbers<[1], [0], [0], [1], [0, 0, 1, 1], [], []>} : vector<128x128xbf16>, vector<128x128xbf16>, vector<128x128xf32> -> vector<128x128xf32>
    %c0_3 = arith.constant 0 : index
    %c0_4 = arith.constant 0 : index
    %3 = vector.load %arg3[%c0_3, %c0_4] : memref<1x128xf32, #tpu.memory_space<vmem>>, vector<1x128xf32>
    %4 = vector.broadcast %3 : vector<1x128xf32> to vector<128x128xf32>
    %5 = arith.addf %2, %4 : vector<128x128xf32>
    %6 = arith.negf %5 : vector<128x128xf32>
    %7 = math.exp %6 : vector<128x128xf32>
    %cst_5 = arith.constant 1.000000e+00 : f32
    %8 = vector.broadcast %cst_5 : f32 to vector<128x128xf32>
    %9 = arith.addf %8, %7 : vector<128x128xf32>
    %10 = arith.divf %8, %9 : vector<128x128xf32>
    %11 = arith.truncf %10 : vector<128x128xf32> to vector<128x128xbf16>
    %c0_6 = arith.constant 0 : index
    %c0_7 = arith.constant 0 : index
    %12 = vector.load %arg4[%c0_6, %c0_7] : memref<128x128xbf16, #tpu.memory_space<vmem>>, vector<128x128xbf16>
    %cst_8 = arith.constant dense<0.000000e+00> : vector<128x128xf32>
    %13 = tpu.matmul %11, %12, %cst_8 {dimension_numbers = #tpu.dot_dimension_numbers<[1], [0], [0], [1], [0, 0, 1, 1], [], []>} : vector<128x128xbf16>, vector<128x128xbf16>, vector<128x128xf32> -> vector<128x128xf32>
    %c0_9 = arith.constant 0 : index
    %c0_10 = arith.constant 0 : index
    %14 = vector.load %arg5[%c0_9, %c0_10] : memref<1x128xf32, #tpu.memory_space<vmem>>, vector<1x128xf32>
    %15 = vector.broadcast %14 : vector<1x128xf32> to vector<128x128xf32>
    %16 = arith.addf %13, %15 : vector<128x128xf32>
    %17 = arith.negf %16 : vector<128x128xf32>
    %18 = math.exp %17 : vector<128x128xf32>
    %cst_11 = arith.constant 1.000000e+00 : f32
    %19 = vector.broadcast %cst_11 : f32 to vector<128x128xf32>
    %20 = arith.addf %19, %18 : vector<128x128xf32>
    %21 = arith.divf %19, %20 : vector<128x128xf32>
    %22 = arith.truncf %21 : vector<128x128xf32> to vector<128x128xbf16>
    %c0_12 = arith.constant 0 : index
    %c0_13 = arith.constant 0 : index
    %23 = vector.load %arg6[%c0_12, %c0_13] : memref<128x128xbf16, #tpu.memory_space<vmem>>, vector<128x128xbf16>
    %cst_14 = arith.constant dense<0.000000e+00> : vector<128x128xf32>
    %24 = tpu.matmul %22, %23, %cst_14 {dimension_numbers = #tpu.dot_dimension_numbers<[1], [0], [0], [1], [0, 0, 1, 1], [], []>} : vector<128x128xbf16>, vector<128x128xbf16>, vector<128x128xf32> -> vector<128x128xf32>
    %c0_15 = arith.constant 0 : index
    %c0_16 = arith.constant 0 : index
    %25 = vector.load %arg7[%c0_15, %c0_16] : memref<1x128xf32, #tpu.memory_space<vmem>>, vector<1x128xf32>
    %26 = vector.broadcast %25 : vector<1x128xf32> to vector<128x128xf32>
    %27 = arith.addf %24, %26 : vector<128x128xf32>
    %28 = arith.negf %27 : vector<128x128xf32>
    %29 = math.exp %28 : vector<128x128xf32>
    %cst_17 = arith.constant 1.000000e+00 : f32
    %30 = vector.broadcast %cst_17 : f32 to vector<128x128xf32>
    %31 = arith.addf %30, %29 : vector<128x128xf32>
    %32 = arith.divf %30, %31 : vector<128x128xf32>
    %c0_18 = arith.constant 0 : index
    %c0_19 = arith.constant 0 : index
    %33 = vector.load %arg8[%c0_18, %c0_19] : memref<128x128xf32, #tpu.memory_space<vmem>>, vector<128x128xf32>
    tpu.vector_store %arg8[%c0_18, %c0_19], %32 {strides = array<i32>} : memref<128x128xf32, #tpu.memory_space<vmem>>, vector<128x128xf32>,
    return
  }
  func.func @transform_0(%arg0: i32) -> (i32, i32) {
    %c0_i32 = arith.constant 0 : i32
    %c0_i32_0 = arith.constant 0 : i32
    return %arg0, %c0_i32 : i32, i32
  }
  func.func @transform_1(%arg0: i32) -> (i32, i32) {
    %c0_i32 = arith.constant 0 : i32
    %c0_i32_0 = arith.constant 0 : i32
    %c0_i32_1 = arith.constant 0 : i32
    return %c0_i32, %c0_i32_0 : i32, i32
  }
  func.func @transform_2(%arg0: i32) -> (i32, i32) {
    %c0_i32 = arith.constant 0 : i32
    %c0_i32_0 = arith.constant 0 : i32
    %c0_i32_1 = arith.constant 0 : i32
    return %c0_i32, %c0_i32_0 : i32, i32
  }
  func.func @transform_3(%arg0: i32) -> (i32, i32) {
    %c0_i32 = arith.constant 0 : i32
    %c0_i32_0 = arith.constant 0 : i32
    %c0_i32_1 = arith.constant 0 : i32
    return %c0_i32, %c0_i32_0 : i32, i32
  }
  func.func @transform_4(%arg0: i32) -> (i32, i32) {
    %c0_i32 = arith.constant 0 : i32
    %c0_i32_0 = arith.constant 0 : i32
    %c0_i32_1 = arith.constant 0 : i32
    return %c0_i32, %c0_i32_0 : i32, i32
  }
  func.func @transform_5(%arg0: i32) -> (i32, i32) {
    %c0_i32 = arith.constant 0 : i32
    %c0_i32_0 = arith.constant 0 : i32
    %c0_i32_1 = arith.constant 0 : i32
    return %c0_i32, %c0_i32_0 : i32, i32
  }
  func.func @transform_6(%arg0: i32) -> (i32, i32) {
    %c0_i32 = arith.constant 0 : i32
    %c0_i32_0 = arith.constant 0 : i32
    %c0_i32_1 = arith.constant 0 : i32
    return %c0_i32, %c0_i32_0 : i32, i32
  }
  func.func @transform_7(%arg0: i32) -> (i32, i32) {
    %c0_i32 = arith.constant 0 : i32
    %c0_i32_0 = arith.constant 0 : i32
    return %arg0, %c0_i32 : i32, i32
  }
}

</mosaic_0001>

<bundles_post_ra>
// kernel: generator_forward.1
= control target key start
LH: loop header
LB: loop body
LE: loop exit
PB: predicated region body
PF: predicated region fallthrough
CT: control target
= control target key end

     0   :  { %s1761_s24 = smov 0   ;;  %s1945_s0 = inlined_call_operand.vmem [shape: bf16[256,128], index: 0, kind: input, shape index: {}]   ;;  %s1946_s1 = inlined_call_operand.vmem [shape: bf16[128,128], index: 1, kind: input, shape index: {}]   ;;  %s1947_s2 = inlined_call_operand.vmem [shape: f32[1,128], index: 2, kind: input, shape index: {}]   ;;  %s1948_s3 = inlined_call_operand.vmem [shape: bf16[128,128], index: 3, kind: input, shape index: {}]   ;;  %s1949_s4 = inlined_call_operand.vmem [shape: f32[1,128], index: 4, kind: input, shape index: {}]   ;;  %s1950_s5 = inlined_call_operand.vmem [shape: bf16[128,128], index: 5, kind: input, shape index: {}]   ;;  %s1951_s6 = inlined_call_operand.vmem [shape: f32[1,128], index: 6, kind: input, shape index: {}]   ;;  %s1952_s7 = inlined_call_operand.vmem [shape: f32[256,128], index: 7, kind: output, shape index: {}]  }
   0x1 LB: > { %s1227_s25 = sadd.s32 4294967295, %s1719_s24   ;;  %p1231_p0 = scmp.ge.s32.totalorder %s1719_s24, 1  ;;  %s1719_s24 = sphi %s1761_s24, %s17_s24  }
   0x2   : > { %p238_p1 = scmp.lt.s32.totalorder %s1719_s24, 3 }
   0x4   : > { %p239_p2 = pnand %p1231_p0, %p238_p1 }
   0x5   : > { %s1232_s28 = sshll.u32 (!%p239_p2), %s1227_s25, 4 }
   0x6   : > { %242 = sbr.rel (%p239_p2) target bundleno = 775 (0x307), region = 48  ;;  %p271_p3 = scmp.lt.s32.totalorder (!%p239_p2), %s1232_s28, 31 }
   0xb   : > { %v1489_v0 = vld [vmem:[%s1946_s1 + $0x38] sm:$0xff]   ;;  %v1490_v1 = vld [vmem:[%s1946_s1 + $0x30] sm:$0xff]   ;;  %s1954_s28 = smov (!%p271_p3, %s1232_s28), 31  ;;  %v1491_v2 = vld [vmem:[%s1946_s1 + $0x28] sm:$0xff]  }
   0xc   : > { %1369 = vmatprep.subr.bf16.mxu0 %v1489_v0  ;;  %s1233_s10 = sshll.u32 %s1954_s28, 2  ;;  %v1492_v3 = vld [vmem:[%s1946_s1 + $0x20] sm:$0xff]   ;;  %v1493_v5 = vld [vmem:[%s1946_s1 + $0x18] sm:$0xff]   ;;  %v1494_v6 = vld [vmem:[%s1946_s1 + $0x10] sm:$0xff]   ;;  %s1235_s20 = sshll.u32 %s1954_s28, 3 }
   0xd   : > { %1370 = vmatpush3.bf16.msra.mxu0 %v1489_v0  ;;  %s1784_s13 = scalar_lea.vmem %s1945_s0, %s1233_s10  ;;  %v1495_v7 = vld [vmem:[%s1946_s1 + $0x8] sm:$0xff]   ;;  %v1496_v8 = vld [vmem:[%s1946_s1] sm:$0xff]   ;;  %v1505_v16 = vld [vmem:[%s1948_s3 + $0x38] sm:$0xff]   ;;  %s1923_s23 = scalar_lea.vmem %s1952_s7, %s1235_s20 }
   0xe   : > { %1371 = vmatprep.subr.bf16.mxu0 %v1490_v1  ;;  %v1497_v4 = vld [vmem:[%s1784_s13] sm:$0xff]   ;;  %v1498_v9 = vld [vmem:[%s1784_s13 + $0x8] sm:$0xff]   ;;  %v1499_v10 = vld [vmem:[%s1784_s13 + $0x10] sm:$0xff]   ;;  %1401 = vmatprep.subr.bf16.mxu1 %v1505_v16 }
   0xf   : > { %1385 = vmatprep.mubr.bf16.mxu0 %v1497_v4  ;;  %v1500_v11 = vld [vmem:[%s1784_s13 + $0x18] sm:$0xff]   ;;  %v1501_v12 = vld [vmem:[%s1784_s13 + $0x20] sm:$0xff]   ;;  %v1502_v13 = vld [vmem:[%s1784_s13 + $0x28] sm:$0xff]   ;;  %1402 = vmatpush3.bf16.msra.mxu1 %v1505_v16 }
  0x10   : > { %v1503_v14 = vld [vmem:[%s1784_s13 + $0x30] sm:$0xff]   ;;  %v1504_v15 = vld [vmem:[%s1784_s13 + $0x38] sm:$0xff]   ;;  %v1507_v18 = vld [vmem:[%s1948_s3 + $0x28] sm:$0xff]  }
  0x11   : > { %1372 = vmatpush3.bf16.msra.mxu0 %v1490_v1  ;;  %v1506_v17 = vld [vmem:[%s1948_s3 + $0x30] sm:$0xff]   ;;  %v1508_v19 = vld [vmem:[%s1948_s3 + $0x20] sm:$0xff]   ;;  %v1509_v20 = vld [vmem:[%s1948_s3 + $0x18] sm:$0xff]  }
  0x12   : > { %1373 = vmatprep.subr.bf16.mxu0 %v1491_v2  ;;  %1403 = vmatprep.subr.bf16.mxu1 %v1506_v17  ;;  %v1510_v21 = vld [vmem:[%s1948_s3 + $0x10] sm:$0xff]   ;;  %v1511_v22 = vld [vmem:[%s1948_s3 + $0x8] sm:$0xff]   ;;  %v1512_v23 = vld [vmem:[%s1948_s3] sm:$0xff]  }
  0x13   : > { %1404 = vmatpush3.bf16.msra.mxu1 %v1506_v17  ;;  %v1836_v24 = vld [vmem:[%s1947_s2] ss:$0 sm:$0xff] }
  0x14   : > { %1405 = vmatprep.subr.bf16.mxu1 %v1507_v18 }
  0x15   : > { %1374 = vmatpush3.bf16.msra.mxu0 %v1491_v2 }
  0x16   : > { %1375 = vmatprep.subr.bf16.mxu0 %v1492_v3 }
  0x17   : > { %1406 = vmatpush3.bf16.msra.mxu1 %v1507_v18 }
  0x18   : > { %1407 = vmatprep.subr.bf16.mxu1 %v1508_v19 }
  0x19   : > { %1376 = vmatpush3.bf16.msra.mxu0 %v1492_v3 }
  0x1a   : > { %1377 = vmatprep.subr.bf16.mxu0 %v1493_v5 }
  0x1b   : > { %1408 = vmatpush3.bf16.msra.mxu1 %v1508_v19 }
  0x1c   : > { %1409 = vmatprep.subr.bf16.mxu1 %v1509_v20 }
  0x1d   : > { %1378 = vmatpush3.bf16.msra.mxu0 %v1493_v5 }
  0x1e   : > { %1379 = vmatprep.subr.bf16.mxu0 %v1494_v6 }
  0x1f   : > { %1410 = vmatpush3.bf16.msra.mxu1 %v1509_v20 }
  0x20   : > { %1411 = vmatprep.subr.bf16.mxu1 %v1510_v21 }
  0x21   : > { %1380 = vmatpush3.bf16.msra.mxu0 %v1494_v6 }
  0x22   : > { %1381 = vmatprep.subr.bf16.mxu0 %v1495_v7 }
  0x23   : > { %1412 = vmatpush3.bf16.msra.mxu1 %v1510_v21 }
  0x24   : > { %1413 = vmatprep.subr.bf16.mxu1 %v1511_v22 }
  0x25   : > { %1382 = vmatpush3.bf16.msra.mxu0 %v1495_v7 }
  0x26   : > { %1383 = vmatprep.subr.bf16.mxu0 %v1496_v8 }
  0x27   : > { %1414 = vmatpush3.bf16.msra.mxu1 %v1511_v22 }
  0x28   : > { %1415 = vmatprep.subr.bf16.mxu1 %v1512_v23 }
  0x29   : > { %1384 = vmatpush3.bf16.msra.mxu0 %v1496_v8 }
  0x2b   : > { %1416 = vmatpush3.bf16.msra.mxu1 %v1512_v23 }
  0x2c   : > { %1386 = vmatmul.mubr.bf16.vlgmr.msra.gmra.mxu0 %v1498_v9 }
  0x2d   : > { %1389 = vmatprep.mubr.bf16.mxu0 %v1499_v10 }
  0x34   : > { %1390 = vmatmul.mubr.bf16.gmra.mxu0 %v1500_v11 }
  0x35   : > { %1393 = vmatprep.mubr.bf16.mxu0 %v1501_v12 }
  0x3c   : > { %1394 = vmatmul.mubr.bf16.gmra.mxu0 %v1502_v13 }
  0x3d   : > { %1397 = vmatprep.mubr.bf16.mxu0 %v1503_v14 }
  0x44   : > { %1398 = vmatmul.mubr.bf16.gmra.mxu0 %v1504_v15 }
  0xec   : > { %v1387_v25 = vpop.f32.mrf.mxu0 }
  0xed   : > { %v461_v26 = vadd.f32 %v1387_v25, %v1836_v24 }
  0xee   : > { %v452_v27 = vpop.f32.mrf.mxu0 }
  0xef   : > { %v1255_v28 = vmul.f32 -1.442695, %v461_v26  ;;  %v453_v29 = vadd.f32 %v1836_v24, %v452_v27 }
  0xf0   : > { %v1388_v30 = vpop.f32.mrf.mxu0 }
  0xf1   : > { %1521 = vpow2.f32 %v1255_v28  ;;  %v1253_v31 = vmul.f32 -1.442695, %v453_v29  ;;  %v464_v32 = vadd.f32 %v1388_v30, %v1836_v24 }
  0xf2   : > { %v455_v33 = vpop.f32.mrf.mxu0 }
  0xf3   : > { %1523 = vpow2.f32 %v1253_v31  ;;  %v1256_v34 = vmul.f32 -1.442695, %v464_v32  ;;  %v456_v35 = vadd.f32 %v1836_v24, %v455_v33 }
  0xf4   : > { %v1391_v36 = vpop.f32.mrf.mxu0 }
  0xf5   : > { %1525 = vpow2.f32 %v1256_v34  ;;  %v1254_v37 = vmul.f32 -1.442695, %v456_v35  ;;  %v477_v38 = vadd.f32 %v1391_v36, %v1836_v24 }
  0xf6   : > { %v468_v39 = vpop.f32.mrf.mxu0 }
  0xf7   : > { %1527 = vpow2.f32 %v1254_v37  ;;  %v1259_v40 = vmul.f32 -1.442695, %v477_v38  ;;  %v469_v41 = vadd.f32 %v1836_v24, %v468_v39 }
  0xf8   : > { %v1392_v42 = vpop.f32.mrf.mxu0 }
  0xf9   : > { %1529 = vpow2.f32 %v1259_v40  ;;  %v1257_v43 = vmul.f32 -1.442695, %v469_v41  ;;  %v480_v44 = vadd.f32 %v1392_v42, %v1836_v24 }
  0xfa   : > { %v471_v45 = vpop.f32.mrf.mxu0 }
  0xfb   : > { %1531 = vpow2.f32 %v1257_v43  ;;  %v1260_v46 = vmul.f32 -1.442695, %v480_v44  ;;  %v472_v47 = vadd.f32 %v1836_v24, %v471_v45 }
  0xfc   : > { %v1395_v48 = vpop.f32.mrf.mxu0 }
  0xfd   : > { %1533 = vpow2.f32 %v1260_v46  ;;  %v1258_v49 = vmul.f32 -1.442695, %v472_v47  ;;  %v493_v50 = vadd.f32 %v1395_v48, %v1836_v24 }
  0xfe   : > { %v1522_v51 = vpop.eup %1521  ;;  %v484_v52 = vpop.f32.mrf.mxu0 }
  0xff   : > { %v565_v53 = vadd.f32 1.0, %v1522_v51  ;;  %1535 = vpow2.f32 %v1258_v49  ;;  %v1263_v54 = vmul.f32 -1.442695, %v493_v50  ;;  %v485_v55 = vadd.f32 %v1836_v24, %v484_v52 }
 0x100   : > { %v1524_v56 = vpop.eup %1523  ;;  %v1396_v57 = vpop.f32.mrf.mxu0 }
 0x101   : > { %1537 = vrcp.f32 %v565_v53  ;;  %v563_v58 = vadd.f32 1.0, %v1524_v56  ;;  %v1261_v59 = vmul.f32 -1.442695, %v485_v55  ;;  %v496_v60 = vadd.f32 %v1396_v57, %v1836_v24 }
 0x102   : > { %v1526_v61 = vpop.eup %1525  ;;  %1539 = vpow2.f32 %v1263_v54  ;;  %v487_v62 = vpop.f32.mrf.mxu0 }
 0x103   : > { %1541 = vrcp.f32 %v563_v58  ;;  %v566_v63 = vadd.f32 1.0, %v1526_v61  ;;  %v1264_v0 = vmul.f32 -1.442695, %v496_v60  ;;  %v488_v1 = vadd.f32 %v1836_v24, %v487_v62 }
 0x104   : > { %v1528_v2 = vpop.eup %1527  ;;  %1543 = vpow2.f32 %v1261_v59  ;;  %v1399_v3 = vpop.f32.mrf.mxu0 }
 0x105   : > { %1545 = vrcp.f32 %v566_v63  ;;  %v564_v4 = vadd.f32 1.0, %v1528_v2  ;;  %v1262_v5 = vmul.f32 -1.442695, %v488_v1  ;;  %v509_v6 = vadd.f32 %v1399_v3, %v1836_v24  ;;  %v1513_v1 = vld [vmem:[%s1950_s5 + $0x38] sm:$0xff]   ;;  %v1514_v2 = vld [vmem:[%s1950_s5 + $0x30] sm:$0xff]   ;;  %v1515_v3 = vld [vmem:[%s1950_s5 + $0x28] sm:$0xff]  }
 0x106   : > { %v1530_v7 = vpop.eup %1529  ;;  %1547 = vpow2.f32 %v1264_v0  ;;  %v500_v8 = vpop.f32.mrf.mxu0  ;;  %1433 = vmatprep.subr.bf16.mxu0 %v1513_v1  ;;  %1465 = vmatprep.subr.bf16.mxu1 %v1513_v1 }
 0x107   : > { %1549 = vrcp.f32 %v564_v4  ;;  %v569_v9 = vadd.f32 1.0, %v1530_v7  ;;  %v1267_v10 = vmul.f32 -1.442695, %v509_v6  ;;  %v501_v11 = vadd.f32 %v1836_v24, %v500_v8  ;;  %1434 = vmatpush3.bf16.msra.mxu0 %v1513_v1  ;;  %v1516_v4 = vld [vmem:[%s1950_s5 + $0x20] sm:$0xff]   ;;  %v1518_v6 = vld [vmem:[%s1950_s5 + $0x10] sm:$0xff]   ;;  %v1519_v7 = vld [vmem:[%s1950_s5 + $0x8] sm:$0xff]  }
 0x108   : > { %v1532_v12 = vpop.eup %1531  ;;  %1551 = vpow2.f32 %v1262_v5  ;;  %v1400_v13 = vpop.f32.mrf.mxu0  ;;  %1435 = vmatprep.subr.bf16.mxu0 %v1514_v2  ;;  %v1517_v5 = vld [vmem:[%s1950_s5 + $0x18] sm:$0xff]   ;;  %v1520_v8 = vld [vmem:[%s1950_s5] sm:$0xff]  }
 0x109   : > { %1553 = vrcp.f32 %v569_v9  ;;  %v567_v14 = vadd.f32 1.0, %v1532_v12  ;;  %v1265_v15 = vmul.f32 -1.442695, %v501_v11  ;;  %v512_v16 = vadd.f32 %v1400_v13, %v1836_v24  ;;  %v1881_v9 = vld [vmem:[%s1949_s4] ss:$0 sm:$0xff] }
 0x10a   : > { %v1534_v17 = vpop.eup %1533  ;;  %1555 = vpow2.f32 %v1267_v10  ;;  %v503_v18 = vpop.f32.mrf.mxu0 }
 0x10b   : > { %1557 = vrcp.f32 %v567_v14  ;;  %v570_v19 = vadd.f32 1.0, %v1534_v17  ;;  %v1268_v20 = vmul.f32 -1.442695, %v512_v16  ;;  %v504_v21 = vadd.f32 %v1836_v24, %v503_v18  ;;  %1436 = vmatpush3.bf16.msra.mxu0 %v1514_v2 }
 0x10c   : > { %v1536_v22 = vpop.eup %1535  ;;  %1559 = vpow2.f32 %v1265_v15  ;;  %1437 = vmatprep.subr.bf16.mxu0 %v1515_v3 }
 0x10d   : > { %1561 = vrcp.f32 %v570_v19  ;;  %v568_v23 = vadd.f32 1.0, %v1536_v22  ;;  %v1266_v25 = vmul.f32 -1.442695, %v504_v21 }
 0x10e   : > { %v1538_v26 = vpop.eup %1537  ;;  %1563 = vpow2.f32 %v1268_v20 }
 0x10f   : > { %v1540_v27 = vpop.eup %1539  ;;  %1565 = vrcp.f32 %v568_v23  ;;  %1438 = vmatpush3.bf16.msra.mxu0 %v1515_v3 }
 0x110   : > { %v1542_v28 = vpop.eup %1541  ;;  %1567 = vpow2.f32 %v1266_v25  ;;  %v573_v36 = vadd.f32 1.0, %v1540_v27  ;;  %1439 = vmatprep.subr.bf16.mxu0 %v1516_v4 }
 0x111   : > { %v1544_v29 = vpop.eup %1543 }
 0x112   : > { %v1546_v30 = vpop.eup %1545  ;;  %v571_v31 = vadd.f32 1.0, %v1544_v29 }
 0x113   : > { %v1548_v32 = vpop.eup %1547  ;;  %v612_v39 = vpack.c.bf16 %v1546_v30, %v1538_v26  ;;  %1440 = vmatpush3.bf16.msra.mxu0 %v1516_v4 }
 0x114   : > { %v1550_v33 = vpop.eup %1549  ;;  %v574_v34 = vadd.f32 1.0, %v1548_v32  ;;  %1569 = vrcp.f32 %v571_v31  ;;  %1441 = vmatprep.subr.bf16.mxu0 %v1517_v5 }
 0x115   : > { %v1552_v35 = vpop.eup %1551  ;;  %v611_v24 = vpack.c.bf16 %v1550_v33, %v1542_v28 }
 0x116   : > { %v1554_v37 = vpop.eup %1553  ;;  %v572_v38 = vadd.f32 1.0, %v1552_v35  ;;  %1571 = vrcp.f32 %v574_v34 }
 0x117   : > { %v1556_v40 = vpop.eup %1555  ;;  %1417 = vmatprep.mubr.bf16.mxu1 %v611_v24  ;;  %1442 = vmatpush3.bf16.msra.mxu0 %v1517_v5 }
 0x118   : > { %v1558_v41 = vpop.eup %1557  ;;  %1573 = vrcp.f32 %v572_v38  ;;  %1418 = vmatmul.mubr.bf16.vlgmr.msra.gmra.mxu1 %v612_v39  ;;  %v577_v49 = vadd.f32 1.0, %v1556_v40  ;;  %1443 = vmatprep.subr.bf16.mxu0 %v1518_v6 }
 0x119   : > { %v1560_v42 = vpop.eup %1559  ;;  %1575 = vrcp.f32 %v573_v36  ;;  %1473 = vmatpush3.bf16.msra.mxu1 %v1513_v1 }
 0x11a   : > { %v1562_v43 = vpop.eup %1561  ;;  %v575_v44 = vadd.f32 1.0, %v1560_v42  ;;  %1466 = vmatprep.subr.bf16.mxu1 %v1514_v2 }
 0x11b   : > { %v1564_v45 = vpop.eup %1563  ;;  %v614_v52 = vpack.c.bf16 %v1562_v43, %v1554_v37  ;;  %1444 = vmatpush3.bf16.msra.mxu0 %v1518_v6 }
 0x11c   : > { %v1566_v46 = vpop.eup %1565  ;;  %v578_v47 = vadd.f32 1.0, %v1564_v45  ;;  %1577 = vrcp.f32 %v575_v44  ;;  %1445 = vmatprep.subr.bf16.mxu0 %v1519_v7 }
 0x11d   : > { %v1568_v48 = vpop.eup %1567  ;;  %v613_v50 = vpack.c.bf16 %v1566_v46, %v1558_v41  ;;  %1474 = vmatpush3.bf16.msra.mxu1 %v1514_v2 }
 0x11e   : > { %v576_v51 = vadd.f32 1.0, %v1568_v48  ;;  %1579 = vrcp.f32 %v578_v47  ;;  %1467 = vmatprep.subr.bf16.mxu1 %v1515_v3 }
 0x11f   : > { %1421 = vmatprep.mubr.bf16.mxu1 %v613_v50  ;;  %1446 = vmatpush3.bf16.msra.mxu0 %v1519_v7 }
 0x120   : > { %1581 = vrcp.f32 %v576_v51  ;;  %1422 = vmatmul.mubr.bf16.gmra.mxu1 %v614_v52  ;;  %1447 = vmatprep.subr.bf16.mxu0 %v1520_v8 }
 0x121   : > { %1583 = vrcp.f32 %v577_v49  ;;  %v1570_v53 = vpop.eup %1569  ;;  %1475 = vmatpush3.bf16.msra.mxu1 %v1515_v3 }
 0x122   : > { %1468 = vmatprep.subr.bf16.mxu1 %v1516_v4 }
 0x123   : > { %v1572_v54 = vpop.eup %1571  ;;  %1448 = vmatpush3.bf16.msra.mxu0 %v1520_v8 }
 0x125   : > { %v1574_v55 = vpop.eup %1573  ;;  %1476 = vmatpush3.bf16.msra.mxu1 %v1516_v4 }
 0x126   : > { %v1576_v56 = vpop.eup %1575  ;;  %v615_v57 = vpack.c.bf16 %v1574_v55, %v1570_v53  ;;  %1469 = vmatprep.subr.bf16.mxu1 %v1517_v5 }
 0x127   : > { %v616_v58 = vpack.c.bf16 %v1572_v54, %v1576_v56 }
 0x128   : > { %1425 = vmatprep.mubr.bf16.mxu1 %v615_v57 }
 0x129   : > { %1426 = vmatmul.mubr.bf16.gmra.mxu1 %v616_v58  ;;  %v1578_v59 = vpop.eup %1577 }
 0x12a   : > { %1477 = vmatpush3.bf16.msra.mxu1 %v1517_v5 }
 0x12b   : > { %v1580_v60 = vpop.eup %1579  ;;  %1470 = vmatprep.subr.bf16.mxu1 %v1518_v6 }
 0x12d   : > { %v1582_v61 = vpop.eup %1581 }
 0x12e   : > { %v1584_v62 = vpop.eup %1583  ;;  %v617_v63 = vpack.c.bf16 %v1582_v61, %v1578_v59  ;;  %1478 = vmatpush3.bf16.msra.mxu1 %v1518_v6 }
 0x12f   : > { %v618_v0 = vpack.c.bf16 %v1580_v60, %v1584_v62  ;;  %1471 = vmatprep.subr.bf16.mxu1 %v1519_v7 }
 0x130   : > { %1429 = vmatprep.mubr.bf16.mxu1 %v617_v63 }
 0x131   : > { %1430 = vmatmul.mubr.bf16.gmra.mxu1 %v618_v0 }
 0x132   : > { %1479 = vmatpush3.bf16.msra.mxu1 %v1519_v7 }
 0x133   : > { %1472 = vmatprep.subr.bf16.mxu1 %v1520_v8 }
 0x136   : > { %1480 = vmatpush3.bf16.msra.mxu1 %v1520_v8 }
 0x1d8   : > { %v1419_v10 = vpop.f32.mrf.mxu1 }
 0x1d9   : > { %v733_v11 = vadd.f32 %v1419_v10, %v1881_v9 }
 0x1da   : > { %v724_v12 = vpop.f32.mrf.mxu1 }
 0x1db   : > { %v1280_v13 = vmul.f32 -1.442695, %v733_v11  ;;  %v725_v14 = vadd.f32 %v1881_v9, %v724_v12 }
 0x1dc   : > { %v1420_v15 = vpop.f32.mrf.mxu1 }
 0x1dd   : > { %1585 = vpow2.f32 %v1280_v13  ;;  %v1278_v16 = vmul.f32 -1.442695, %v725_v14  ;;  %v736_v17 = vadd.f32 %v1420_v15, %v1881_v9 }
 0x1de   : > { %v727_v18 = vpop.f32.mrf.mxu1 }
 0x1df   : > { %1587 = vpow2.f32 %v1278_v16  ;;  %v1281_v19 = vmul.f32 -1.442695, %v736_v17  ;;  %v728_v20 = vadd.f32 %v1881_v9, %v727_v18 }
 0x1e0   : > { %v1423_v21 = vpop.f32.mrf.mxu1 }
 0x1e1   : > { %1589 = vpow2.f32 %v1281_v19  ;;  %v1279_v22 = vmul.f32 -1.442695, %v728_v20  ;;  %v749_v23 = vadd.f32 %v1423_v21, %v1881_v9 }
 0x1e2   : > { %v740_v25 = vpop.f32.mrf.mxu1 }
 0x1e3   : > { %1591 = vpow2.f32 %v1279_v22  ;;  %v1284_v26 = vmul.f32 -1.442695, %v749_v23  ;;  %v741_v27 = vadd.f32 %v1881_v9, %v740_v25 }
 0x1e4   : > { %v1424_v28 = vpop.f32.mrf.mxu1 }
 0x1e5   : > { %1593 = vpow2.f32 %v1284_v26  ;;  %v1282_v29 = vmul.f32 -1.442695, %v741_v27  ;;  %v752_v30 = vadd.f32 %v1424_v28, %v1881_v9 }
 0x1e6   : > { %v743_v31 = vpop.f32.mrf.mxu1 }
 0x1e7   : > { %1595 = vpow2.f32 %v1282_v29  ;;  %v1285_v32 = vmul.f32 -1.442695, %v752_v30  ;;  %v744_v33 = vadd.f32 %v1881_v9, %v743_v31 }
 0x1e9   : > { %1597 = vpow2.f32 %v1285_v32  ;;  %v1283_v34 = vmul.f32 -1.442695, %v744_v33  ;;  %v1427_v35 = vpop.f32.mrf.mxu1 }
 0x1ea   : > { %v1586_v36 = vpop.eup %1585  ;;  %v765_v24 = vadd.f32 %v1427_v35, %v1881_v9 }
 0x1eb   : > { %v837_v37 = vadd.f32 1.0, %v1586_v36  ;;  %1599 = vpow2.f32 %v1283_v34  ;;  %v756_v38 = vpop.f32.mrf.mxu1 }
 0x1ec   : > { %v1588_v39 = vpop.eup %1587  ;;  %v1288_v40 = vmul.f32 -1.442695, %v765_v24  ;;  %v757_v41 = vadd.f32 %v1881_v9, %v756_v38 }
 0x1ed   : > { %1601 = vrcp.f32 %v837_v37  ;;  %v835_v42 = vadd.f32 1.0, %v1588_v39  ;;  %v1428_v43 = vpop.f32.mrf.mxu1 }
 0x1ee   : > { %v1590_v44 = vpop.eup %1589  ;;  %1603 = vpow2.f32 %v1288_v40  ;;  %v1286_v45 = vmul.f32 -1.442695, %v757_v41  ;;  %v768_v46 = vadd.f32 %v1428_v43, %v1881_v9 }
 0x1ef   : > { %1605 = vrcp.f32 %v835_v42  ;;  %v838_v47 = vadd.f32 1.0, %v1590_v44  ;;  %v759_v48 = vpop.f32.mrf.mxu1 }
 0x1f0   : > { %v1592_v49 = vpop.eup %1591  ;;  %1607 = vpow2.f32 %v1286_v45  ;;  %v1289_v50 = vmul.f32 -1.442695, %v768_v46  ;;  %v760_v51 = vadd.f32 %v1881_v9, %v759_v48 }
 0x1f1   : > { %1609 = vrcp.f32 %v838_v47  ;;  %v836_v52 = vadd.f32 1.0, %v1592_v49  ;;  %v1431_v53 = vpop.f32.mrf.mxu1 }
 0x1f2   : > { %v1594_v54 = vpop.eup %1593  ;;  %1611 = vpow2.f32 %v1289_v50  ;;  %v1287_v55 = vmul.f32 -1.442695, %v760_v51  ;;  %v781_v56 = vadd.f32 %v1431_v53, %v1881_v9  ;;  %v1902_v50 = vld [vmem:[%s1951_s6] ss:$0 sm:$0xff] }
 0x1f3   : > { %1613 = vrcp.f32 %v836_v52  ;;  %v841_v57 = vadd.f32 1.0, %v1594_v54  ;;  %v772_v58 = vpop.f32.mrf.mxu1 }
 0x1f4   : > { %v1596_v59 = vpop.eup %1595  ;;  %1615 = vpow2.f32 %v1287_v55  ;;  %v1292_v60 = vmul.f32 -1.442695, %v781_v56  ;;  %v773_v61 = vadd.f32 %v1881_v9, %v772_v58 }
 0x1f5   : > { %1617 = vrcp.f32 %v841_v57  ;;  %v839_v62 = vadd.f32 1.0, %v1596_v59  ;;  %v1432_v63 = vpop.f32.mrf.mxu1 }
 0x1f6   : > { %v1598_v0 = vpop.eup %1597  ;;  %1619 = vpow2.f32 %v1292_v60  ;;  %v1290_v1 = vmul.f32 -1.442695, %v773_v61  ;;  %v784_v2 = vadd.f32 %v1432_v63, %v1881_v9 }
 0x1f7   : > { %1621 = vrcp.f32 %v839_v62  ;;  %v842_v3 = vadd.f32 1.0, %v1598_v0  ;;  %v775_v4 = vpop.f32.mrf.mxu1 }
 0x1f8   : > { %v1600_v5 = vpop.eup %1599  ;;  %1623 = vpow2.f32 %v1290_v1  ;;  %v1293_v6 = vmul.f32 -1.442695, %v784_v2  ;;  %v776_v7 = vadd.f32 %v1881_v9, %v775_v4 }
 0x1f9   : > { %1625 = vrcp.f32 %v842_v3  ;;  %v840_v8 = vadd.f32 1.0, %v1600_v5 }
 0x1fa   : > { %v1602_v10 = vpop.eup %1601  ;;  %1627 = vpow2.f32 %v1293_v6  ;;  %v1291_v11 = vmul.f32 -1.442695, %v776_v7 }
 0x1fb   : > { %v1604_v12 = vpop.eup %1603  ;;  %1629 = vrcp.f32 %v840_v8 }
 0x1fc   : > { %v1606_v13 = vpop.eup %1605  ;;  %1631 = vpow2.f32 %v1291_v11  ;;  %v845_v21 = vadd.f32 1.0, %v1604_v12 }
 0x1fd   : > { %v1608_v14 = vpop.eup %1607 }
 0x1fe   : > { %v1610_v15 = vpop.eup %1609  ;;  %v843_v16 = vadd.f32 1.0, %v1608_v14 }
 0x1ff   : > { %v1612_v17 = vpop.eup %1611  ;;  %v884_v25 = vpack.c.bf16 %v1610_v15, %v1602_v10 }
 0x200   : > { %v1614_v18 = vpop.eup %1613  ;;  %v846_v19 = vadd.f32 1.0, %v1612_v17  ;;  %1633 = vrcp.f32 %v843_v16 }
 0x201   : > { %v1616_v20 = vpop.eup %1615  ;;  %v883_v22 = vpack.c.bf16 %v1614_v18, %v1606_v13 }
 0x202   : > { %v1618_v23 = vpop.eup %1617  ;;  %v844_v9 = vadd.f32 1.0, %v1616_v20  ;;  %1635 = vrcp.f32 %v846_v19 }
 0x203   : > { %v1620_v26 = vpop.eup %1619  ;;  %1449 = vmatprep.mubr.bf16.mxu0 %v883_v22 }
 0x204   : > { %v1622_v27 = vpop.eup %1621  ;;  %1637 = vrcp.f32 %v844_v9  ;;  %1450 = vmatmul.mubr.bf16.vlgmr.msra.gmra.mxu0 %v884_v25  ;;  %v849_v35 = vadd.f32 1.0, %v1620_v26 }
 0x205   : > { %v1624_v28 = vpop.eup %1623  ;;  %1639 = vrcp.f32 %v845_v21 }
 0x206   : > { %v1626_v29 = vpop.eup %1625  ;;  %v847_v30 = vadd.f32 1.0, %v1624_v28 }
 0x207   : > { %v1628_v31 = vpop.eup %1627  ;;  %v886_v37 = vpack.c.bf16 %v1626_v29, %v1618_v23 }
 0x208   : > { %v1630_v32 = vpop.eup %1629  ;;  %v850_v33 = vadd.f32 1.0, %v1628_v31  ;;  %1641 = vrcp.f32 %v847_v30 }
 0x209   : > { %v1632_v34 = vpop.eup %1631  ;;  %v885_v36 = vpack.c.bf16 %v1630_v32, %v1622_v27 }
 0x20a   : > { %v848_v24 = vadd.f32 1.0, %v1632_v34  ;;  %1643 = vrcp.f32 %v850_v33 }
 0x20b   : > { %1453 = vmatprep.mubr.bf16.mxu0 %v885_v36 }
 0x20c   : > { %1645 = vrcp.f32 %v848_v24  ;;  %1454 = vmatmul.mubr.bf16.gmra.mxu0 %v886_v37 }
 0x20d   : > { %1647 = vrcp.f32 %v849_v35  ;;  %v1634_v38 = vpop.eup %1633 }
 0x20f   : > { %v1636_v39 = vpop.eup %1635 }
 0x211   : > { %v1638_v40 = vpop.eup %1637 }
 0x212   : > { %v1640_v41 = vpop.eup %1639  ;;  %v887_v42 = vpack.c.bf16 %v1638_v40, %v1634_v38 }
 0x213   : > { %v888_v43 = vpack.c.bf16 %v1636_v39, %v1640_v41 }
 0x214   : > { %1457 = vmatprep.mubr.bf16.mxu1 %v887_v42 }
 0x215   : > { %1458 = vmatmul.mubr.bf16.vlgmr.msra.gmra.mxu1 %v888_v43  ;;  %v1642_v44 = vpop.eup %1641 }
 0x217   : > { %v1644_v45 = vpop.eup %1643 }
 0x219   : > { %v1646_v46 = vpop.eup %1645 }
 0x21a   : > { %v1648_v47 = vpop.eup %1647  ;;  %v889_v48 = vpack.c.bf16 %v1646_v46, %v1642_v44 }
 0x21b   : > { %v890_v49 = vpack.c.bf16 %v1644_v45, %v1648_v47 }
 0x21c   : > { %1461 = vmatprep.mubr.bf16.mxu1 %v889_v48 }
 0x21d   : > { %1462 = vmatmul.mubr.bf16.gmra.mxu1 %v890_v49 }
 0x2c4   : > { %v1451_v51 = vpop.f32.mrf.mxu0 }
 0x2c5   : > { %v1005_v52 = vadd.f32 %v1451_v51, %v1902_v50 }
 0x2c6   : > { %v996_v53 = vpop.f32.mrf.mxu0 }
 0x2c7   : > { %v1305_v54 = vmul.f32 -1.442695, %v1005_v52  ;;  %v997_v55 = vadd.f32 %v1902_v50, %v996_v53 }
 0x2c8   : > { %v1452_v56 = vpop.f32.mrf.mxu0 }
 0x2c9   : > { %1649 = vpow2.f32 %v1305_v54  ;;  %v1303_v57 = vmul.f32 -1.442695, %v997_v55  ;;  %v1008_v58 = vadd.f32 %v1452_v56, %v1902_v50 }
 0x2ca   : > { %v999_v59 = vpop.f32.mrf.mxu0 }
 0x2cb   : > { %1651 = vpow2.f32 %v1303_v57  ;;  %v1306_v60 = vmul.f32 -1.442695, %v1008_v58  ;;  %v1000_v61 = vadd.f32 %v1902_v50, %v999_v59 }
 0x2cc   : > { %v1455_v62 = vpop.f32.mrf.mxu0 }
 0x2cd   : > { %1653 = vpow2.f32 %v1306_v60  ;;  %v1304_v63 = vmul.f32 -1.442695, %v1000_v61  ;;  %v1021_v0 = vadd.f32 %v1455_v62, %v1902_v50 }
 0x2ce   : > { %v1012_v1 = vpop.f32.mrf.mxu0 }
 0x2cf   : > { %1655 = vpow2.f32 %v1304_v63  ;;  %v1309_v2 = vmul.f32 -1.442695, %v1021_v0  ;;  %v1013_v3 = vadd.f32 %v1902_v50, %v1012_v1 }
 0x2d0   : > { %v1456_v4 = vpop.f32.mrf.mxu0 }
 0x2d1   : > { %1657 = vpow2.f32 %v1309_v2  ;;  %v1307_v5 = vmul.f32 -1.442695, %v1013_v3  ;;  %v1024_v6 = vadd.f32 %v1456_v4, %v1902_v50 }
 0x2d2   : > { %v1015_v7 = vpop.f32.mrf.mxu0 }
 0x2d3   : > { %1659 = vpow2.f32 %v1307_v5  ;;  %v1310_v8 = vmul.f32 -1.442695, %v1024_v6  ;;  %v1016_v10 = vadd.f32 %v1902_v50, %v1015_v7 }
 0x2d5   : > { %1661 = vpow2.f32 %v1310_v8  ;;  %v1308_v11 = vmul.f32 -1.442695, %v1016_v10  ;;  %v1459_v12 = vpop.f32.mrf.mxu1 }
 0x2d6   : > { %v1650_v13 = vpop.eup %1649  ;;  %v1037_v14 = vadd.f32 %v1459_v12, %v1902_v50 }
 0x2d7   : > { %v1109_v15 = vadd.f32 1.0, %v1650_v13  ;;  %1663 = vpow2.f32 %v1308_v11  ;;  %v1028_v16 = vpop.f32.mrf.mxu1 }
 0x2d8   : > { %v1652_v17 = vpop.eup %1651  ;;  %v1313_v18 = vmul.f32 -1.442695, %v1037_v14  ;;  %v1029_v19 = vadd.f32 %v1902_v50, %v1028_v16 }
 0x2d9   : > { %1665 = vrcp.f32 %v1109_v15  ;;  %v1107_v20 = vadd.f32 1.0, %v1652_v17  ;;  %v1460_v21 = vpop.f32.mrf.mxu1 }
 0x2da   : > { %v1654_v22 = vpop.eup %1653  ;;  %1667 = vpow2.f32 %v1313_v18  ;;  %v1311_v23 = vmul.f32 -1.442695, %v1029_v19  ;;  %v1040_v9 = vadd.f32 %v1460_v21, %v1902_v50 }
 0x2db   : > { %1669 = vrcp.f32 %v1107_v20  ;;  %v1110_v25 = vadd.f32 1.0, %v1654_v22  ;;  %v1031_v26 = vpop.f32.mrf.mxu1 }
 0x2dc   : > { %v1656_v27 = vpop.eup %1655  ;;  %1671 = vpow2.f32 %v1311_v23  ;;  %v1314_v28 = vmul.f32 -1.442695, %v1040_v9  ;;  %v1032_v29 = vadd.f32 %v1902_v50, %v1031_v26 }
 0x2dd   : > { %1673 = vrcp.f32 %v1110_v25  ;;  %v1108_v30 = vadd.f32 1.0, %v1656_v27  ;;  %v1463_v31 = vpop.f32.mrf.mxu1 }
 0x2de   : > { %v1658_v32 = vpop.eup %1657  ;;  %1675 = vpow2.f32 %v1314_v28  ;;  %v1312_v33 = vmul.f32 -1.442695, %v1032_v29  ;;  %v1053_v34 = vadd.f32 %v1463_v31, %v1902_v50 }
 0x2df   : > { %1677 = vrcp.f32 %v1108_v30  ;;  %v1113_v35 = vadd.f32 1.0, %v1658_v32  ;;  %v1044_v36 = vpop.f32.mrf.mxu1 }
 0x2e0   : > { %v1660_v24 = vpop.eup %1659  ;;  %1679 = vpow2.f32 %v1312_v33  ;;  %v1317_v37 = vmul.f32 -1.442695, %v1053_v34  ;;  %v1045_v38 = vadd.f32 %v1902_v50, %v1044_v36 }
 0x2e1   : > { %1681 = vrcp.f32 %v1113_v35  ;;  %v1111_v39 = vadd.f32 1.0, %v1660_v24  ;;  %v1464_v40 = vpop.f32.mrf.mxu1 }
 0x2e2   : > { %v1662_v41 = vpop.eup %1661  ;;  %1683 = vpow2.f32 %v1317_v37  ;;  %v1315_v42 = vmul.f32 -1.442695, %v1045_v38  ;;  %v1056_v43 = vadd.f32 %v1464_v40, %v1902_v50 }
 0x2e3   : > { %1685 = vrcp.f32 %v1111_v39  ;;  %v1114_v44 = vadd.f32 1.0, %v1662_v41  ;;  %v1047_v45 = vpop.f32.mrf.mxu1 }
 0x2e4   : > { %v1664_v46 = vpop.eup %1663  ;;  %1687 = vpow2.f32 %v1315_v42  ;;  %v1318_v47 = vmul.f32 -1.442695, %v1056_v43  ;;  %v1048_v48 = vadd.f32 %v1902_v50, %v1047_v45 }
 0x2e5   : > { %1689 = vrcp.f32 %v1114_v44  ;;  %v1112_v49 = vadd.f32 1.0, %v1664_v46 }
 0x2e6   : > { %v1666_v51 = vpop.eup %1665  ;;  %1691 = vpow2.f32 %v1318_v47  ;;  %v1316_v52 = vmul.f32 -1.442695, %v1048_v48 }
 0x2e7   : > { %v1668_v53 = vpop.eup %1667  ;;  %1157 = vst [vmem:[%s1923_s23 + $0x10] sm:$0xff] %v1666_v51  ;;  %1693 = vrcp.f32 %v1112_v49 }
 0x2e8   : > { %v1670_v54 = vpop.eup %1669  ;;  %v1117_v55 = vadd.f32 1.0, %v1668_v53  ;;  %1695 = vpow2.f32 %v1316_v52 }
 0x2e9   : > { %v1672_v56 = vpop.eup %1671  ;;  %1155 = vst [vmem:[%s1923_s23] sm:$0xff] %v1670_v54 }
 0x2ea   : > { %v1674_v57 = vpop.eup %1673  ;;  %1697 = vrcp.f32 %v1117_v55  ;;  %v1115_v58 = vadd.f32 1.0, %v1672_v56 }
 0x2eb   : > { %v1676_v50 = vpop.eup %1675  ;;  %1158 = vst [vmem:[%s1923_s23 + $0x18] sm:$0xff] %v1674_v57 }
 0x2ec   : > { %v1678_v59 = vpop.eup %1677  ;;  %1699 = vrcp.f32 %v1115_v58  ;;  %v1118_v60 = vadd.f32 1.0, %v1676_v50 }
 0x2ed   : > { %v1680_v61 = vpop.eup %1679  ;;  %1156 = vst [vmem:[%s1923_s23 + $0x8] sm:$0xff] %v1678_v59 }
 0x2ee   : > { %v1682_v62 = vpop.eup %1681  ;;  %1701 = vrcp.f32 %v1118_v60  ;;  %v1116_v63 = vadd.f32 1.0, %v1680_v61 }
 0x2ef   : > { %v1684_v0 = vpop.eup %1683  ;;  %1161 = vst [vmem:[%s1923_s23 + $0x30] sm:$0xff] %v1682_v62 }
 0x2f0   : > { %v1686_v1 = vpop.eup %1685  ;;  %1703 = vrcp.f32 %v1116_v63  ;;  %v1121_v2 = vadd.f32 1.0, %v1684_v0 }
 0x2f1   : > { %v1688_v3 = vpop.eup %1687  ;;  %1159 = vst [vmem:[%s1923_s23 + $0x20] sm:$0xff] %v1686_v1 }
 0x2f2   : > { %v1690_v4 = vpop.eup %1689  ;;  %1705 = vrcp.f32 %v1121_v2  ;;  %v1119_v5 = vadd.f32 1.0, %v1688_v3 }
 0x2f3   : > { %v1692_v6 = vpop.eup %1691  ;;  %1162 = vst [vmem:[%s1923_s23 + $0x38] sm:$0xff] %v1690_v4 }
 0x2f4   : > { %v1694_v7 = vpop.eup %1693  ;;  %1707 = vrcp.f32 %v1119_v5  ;;  %v1122_v8 = vadd.f32 1.0, %v1692_v6 }
 0x2f5   : > { %v1696_v10 = vpop.eup %1695  ;;  %1160 = vst [vmem:[%s1923_s23 + $0x28] sm:$0xff] %v1694_v7 }
 0x2f6   : > { %1709 = vrcp.f32 %v1122_v8  ;;  %v1120_v11 = vadd.f32 1.0, %v1696_v10 }
 0x2f7   : > { %v1698_v12 = vpop.eup %1697 }
 0x2f8   : > { %1165 = vst [vmem:[%s1923_s23 + $0x50] sm:$0xff] %v1698_v12  ;;  %1711 = vrcp.f32 %v1120_v11 }
 0x2f9   : > { %v1700_v13 = vpop.eup %1699 }
 0x2fa   : > { %1163 = vst [vmem:[%s1923_s23 + $0x40] sm:$0xff] %v1700_v13 }
 0x2fb   : > { %v1702_v14 = vpop.eup %1701 }
 0x2fc   : > { %1166 = vst [vmem:[%s1923_s23 + $0x58] sm:$0xff] %v1702_v14 }
 0x2fd   : > { %v1704_v15 = vpop.eup %1703 }
 0x2fe   : > { %1164 = vst [vmem:[%s1923_s23 + $0x48] sm:$0xff] %v1704_v15 }
 0x2ff   : > { %v1706_v16 = vpop.eup %1705 }
 0x300   : > { %1169 = vst [vmem:[%s1923_s23 + $0x70] sm:$0xff] %v1706_v16 }
 0x301   : > { %v1708_v17 = vpop.eup %1707 }
 0x302   : > { %1167 = vst [vmem:[%s1923_s23 + $0x60] sm:$0xff] %v1708_v17 }
 0x303   : > { %v1710_v18 = vpop.eup %1709 }
 0x304   : > { %1170 = vst [vmem:[%s1923_s23 + $0x78] sm:$0xff] %v1710_v18 }
 0x305   : > { %v1712_v19 = vpop.eup %1711 }
 0x306   : > { %1168 = vst [vmem:[%s1923_s23 + $0x68] sm:$0xff] %v1712_v19 }
 0x307 PF: > { %s17_s24 = sadd.s32 1, %s1719_s24  }
 0x308   : > { %p14_p4 = scmp.ge.s32.totalorder %s17_s24, 4  }
 0x30a   :  { %16 = sbr.rel (!%p14_p4) target bundleno = 1 (0x1), region = 78 }

</bundles_post_ra>
